<compile_context>
chip_gen: v6e
topology: v6e:2x2x1
jax: 0.10.0
libtpu: 0.0.40
codegen_flags: <defaults>
</compile_context>

<pallas_src>
import jax
import jax.numpy as jnp
from jax.experimental import pallas as pl
from jax.experimental.pallas import tpu as pltpu

K_IN = 28 * 28      # 784 — full-extent contraction dim, no padding
H1 = 128            # fc1 width (already lane-dense)
H2_PAD = 128        # fc2 width padded 64 -> 128
OUT_PAD = 128       # logits padded 10 -> 128 (unmasked dense store)


def mlp_kernel(x_ref, w1_ref, w2_ref, w3_ref, b_ref, o_ref):
    # fc1 + relu : (TB, 784) @ (784, 128), bf16 operands, f32 accumulate.
    h1 = jnp.dot(x_ref[...], w1_ref[...], preferred_element_type=jnp.float32)
    h1 = jnp.maximum(h1 + b_ref[0:1, :], 0.0).astype(jnp.bfloat16)
    # fc2 + relu : (TB, 128) @ (128, 128)   (cols 64..127 are zero-padded)
    h2 = jnp.dot(h1, w2_ref[...], preferred_element_type=jnp.float32)
    h2 = jnp.maximum(h2 + b_ref[1:2, :], 0.0).astype(jnp.bfloat16)
    # fc3 logits : (TB, 128) @ (128, 128)   (cols 10..127 are zero-padded)
    o = jnp.dot(h2, w3_ref[...], preferred_element_type=jnp.float32)
    o_ref[...] = (o + b_ref[2:3, :]).astype(o_ref.dtype)


def prep_params(params):
    """Cast / zero-pad parameters once, outside the kernel.

    Weights are stored [in, out] (transposed vs. PyTorch) so the kernel
    computes x @ W + b directly.  Weights -> bf16, biases stay f32.
    """
    w1, b1, w2, b2, w3, b3 = params
    w1_p = w1.astype(jnp.bfloat16)                                   # (784, 128)
    w2_p = jnp.zeros((H1, H2_PAD), jnp.bfloat16).at[:, :64].set(
        w2.astype(jnp.bfloat16))                                     # (128, 128)
    w3_p = jnp.zeros((H2_PAD, OUT_PAD), jnp.bfloat16).at[:64, :10].set(
        w3.astype(jnp.bfloat16))                                     # (128, 128)
    b_p = jnp.zeros((3, OUT_PAD), jnp.float32)
    b_p = b_p.at[0, :H1].set(b1.reshape(-1))
    b_p = b_p.at[1, :64].set(b2.reshape(-1))
    b_p = b_p.at[2, :10].set(b3.reshape(-1))
    return w1_p, w2_p, w3_p, b_p


def _round_up(n, m):
    return ((n + m - 1) // m) * m


def red_mnist_forward(x, params, tb=2048):
    """x: [B, 1, 28, 28] or [B, 784]. Returns f32 logits [B, 10]."""
    x2d = x.reshape(-1, K_IN).astype(jnp.bfloat16)   # one cast, no K padding
    B = x2d.shape[0]

    # Batch tile: multiple of 16 (bf16 sublane packing), capped at tb.
    TB = _round_up(min(tb, B), 16)
    if TB > B:                         # tiny batch: pad up to a single tile
        x2d = jnp.pad(x2d, ((0, TB - B), (0, 0)))
        B_eff = TB
    else:                              # ragged last tile -> Pallas edge clipping
        B_eff = B
    n_steps = pl.cdiv(B_eff, TB)

    w1_p, w2_p, w3_p, b_p = prep_params(params)

    # Triple-buffer only the dominant (x) DMA stream when the grid is deep.
    x_kwargs = {"pipeline_mode": pl.Buffered(3)} if n_steps >= 3 else {}
    x_spec = pl.BlockSpec((TB, K_IN), lambda i: (i, 0), **x_kwargs)
    const = lambda shape: pl.BlockSpec(shape, lambda i: (0, 0))

    flops = 2 * B_eff * (K_IN * H1 + H1 * H2_PAD + H2_PAD * OUT_PAD)
    bytes_accessed = (
        2 * B_eff * K_IN                                     # x in (bf16)
        + 2 * (K_IN * H1 + H1 * H2_PAD + H2_PAD * OUT_PAD)   # weights (bf16)
        + 4 * 3 * OUT_PAD                                    # biases (f32)
        + 2 * B_eff * OUT_PAD                                # logits out (bf16)
    )

    out = pl.pallas_call(
        mlp_kernel,
        out_shape=jax.ShapeDtypeStruct((B_eff, OUT_PAD), jnp.bfloat16),
        grid_spec=pltpu.PrefetchScalarGridSpec(
            num_scalar_prefetch=0,
            grid=(n_steps,),
            in_specs=[
                x_spec,                          # x tile (pipelined)
                const((K_IN, H1)),               # w1 (VMEM-resident)
                const((H1, H2_PAD)),             # w2
                const((H2_PAD, OUT_PAD)),        # w3
                const((3, OUT_PAD)),             # biases [b1; b2; b3]
            ],
            out_specs=pl.BlockSpec((TB, OUT_PAD), lambda i: (i, 0)),
        ),
        compiler_params=pltpu.CompilerParams(
            dimension_semantics=("parallel",),
        ),
        cost_estimate=pl.CostEstimate(
            flops=flops, transcendentals=0, bytes_accessed=bytes_accessed
        ),
    )(x2d, w1_p, w2_p, w3_p, b_p)

    return out[:B, :10].astype(jnp.float32)


def init_params(key):
    """Deterministic synthetic parameters with nn.Linear fan-in init (f32)."""
    k1, k2, k3, k4, k5, k6 = jax.random.split(key, 6)

    def uniform_init(k, shape, fan_in):
        bound = 1.0 / jnp.sqrt(fan_in)
        return jax.random.uniform(k, shape, jnp.float32, -bound, bound)

    w1 = uniform_init(k1, (K_IN, 128), K_IN)
    b1 = uniform_init(k2, (1, 128), K_IN)
    w2 = uniform_init(k3, (128, 64), 128)
    b2 = uniform_init(k4, (1, 64), 128)
    w3 = uniform_init(k5, (64, 10), 64)
    b3 = uniform_init(k6, (1, 10), 64)
    return (w1, b1, w2, b2, w3, b3)


def reference_forward(x, params):
    """Pure-f32 reference matching the PyTorch module."""
    w1, b1, w2, b2, w3, b3 = params
    x2d = x.reshape(-1, K_IN)
    h1 = jnp.maximum(x2d @ w1 + b1, 0.0)
    h2 = jnp.maximum(h1 @ w2 + b2, 0.0)
    return h2 @ w3 + b3


if __name__ == "__main__":
    key = jax.random.PRNGKey(0)
    kx, kp = jax.random.split(key)

    B = 8
    x = jax.random.normal(kx, (B, 1, 28, 28), dtype=jnp.float32)
    params = init_params(kp)

    out = red_mnist_forward(x, params)
    out = jax.block_until_ready(out)

    ref = reference_forward(x, params)
    assert out.shape == (B, 10), out.shape
    # bf16 inputs/weights (f32 accumulation) vs f32 reference -> relaxed tol.
    assert jnp.allclose(out, ref, atol=5e-2, rtol=5e-2), (
        "mismatch vs reference, max abs diff = "
        + str(float(jnp.max(jnp.abs(out - ref)))))
    print("KERNEL_OK")
</pallas_src>

<mosaic_0001>
module attributes {stable_mosaic.version = 11 : i64} {
  func.func @mlp_kernel(%arg0: i32, %arg1: memref<16x784xbf16, #tpu.memory_space<vmem>>, %arg2: memref<784x128xbf16, #tpu.memory_space<vmem>>, %arg3: memref<128x128xbf16, #tpu.memory_space<vmem>>, %arg4: memref<128x128xbf16, #tpu.memory_space<vmem>>, %arg5: memref<3x128xf32, #tpu.memory_space<vmem>>, %arg6: memref<16x128xbf16, #tpu.memory_space<vmem>>) attributes {dimension_semantics = [#tpu.dimension_semantics<parallel>], iteration_bounds = array<i64: 1>, scalar_prefetch = 0 : i64, scratch_operands = 0 : i64, tpu.core_type = #tpu.core_type<tc>, window_params = [{transform_indices = @transform_0, window_bounds = array<i64: 16, 784>}, {pipeline_mode = #tpu.pipeline_mode<synchronous>, transform_indices = @transform_1, window_bounds = array<i64: 784, 128>}, {pipeline_mode = #tpu.pipeline_mode<synchronous>, transform_indices = @transform_2, window_bounds = array<i64: 128, 128>}, {pipeline_mode = #tpu.pipeline_mode<synchronous>, transform_indices = @transform_3, window_bounds = array<i64: 128, 128>}, {pipeline_mode = #tpu.pipeline_mode<synchronous>, transform_indices = @transform_4, window_bounds = array<i64: 3, 128>}, {transform_indices = @transform_5, window_bounds = array<i64: 16, 128>}]} {
    %c0 = arith.constant 0 : index
    %c0_0 = arith.constant 0 : index
    %0 = vector.load %arg1[%c0, %c0_0] : memref<16x784xbf16, #tpu.memory_space<vmem>>, vector<16x784xbf16>
    %c0_1 = arith.constant 0 : index
    %c0_2 = arith.constant 0 : index
    %1 = vector.load %arg2[%c0_1, %c0_2] : memref<784x128xbf16, #tpu.memory_space<vmem>>, vector<784x128xbf16>
    %cst = arith.constant dense<0.000000e+00> : vector<16x128xf32>
    %2 = tpu.matmul %0, %1, %cst {dimension_numbers = #tpu.dot_dimension_numbers<[1], [0], [0], [1], [0, 0, 1, 1], [], []>} : vector<16x784xbf16>, vector<784x128xbf16>, vector<16x128xf32> -> vector<16x128xf32>
    %c0_3 = arith.constant 0 : index
    %c0_4 = arith.constant 0 : index
    %3 = vector.load %arg5[%c0_3, %c0_4] : memref<3x128xf32, #tpu.memory_space<vmem>>, vector<1x128xf32>
    %4 = vector.broadcast %3 : vector<1x128xf32> to vector<16x128xf32>
    %5 = arith.addf %2, %4 : vector<16x128xf32>
    %cst_5 = arith.constant 0.000000e+00 : f32
    %6 = vector.broadcast %cst_5 : f32 to vector<16x128xf32>
    %7 = arith.maximumf %5, %6 : vector<16x128xf32>
    %8 = arith.truncf %7 : vector<16x128xf32> to vector<16x128xbf16>
    %c0_6 = arith.constant 0 : index
    %c0_7 = arith.constant 0 : index
    %9 = vector.load %arg3[%c0_6, %c0_7] : memref<128x128xbf16, #tpu.memory_space<vmem>>, vector<128x128xbf16>
    %cst_8 = arith.constant dense<0.000000e+00> : vector<16x128xf32>
    %10 = tpu.matmul %8, %9, %cst_8 {dimension_numbers = #tpu.dot_dimension_numbers<[1], [0], [0], [1], [0, 0, 1, 1], [], []>} : vector<16x128xbf16>, vector<128x128xbf16>, vector<16x128xf32> -> vector<16x128xf32>
    %c1 = arith.constant 1 : index
    %c0_9 = arith.constant 0 : index
    %11 = vector.load %arg5[%c1, %c0_9] : memref<3x128xf32, #tpu.memory_space<vmem>>, vector<1x128xf32>
    %12 = vector.broadcast %11 : vector<1x128xf32> to vector<16x128xf32>
    %13 = arith.addf %10, %12 : vector<16x128xf32>
    %cst_10 = arith.constant 0.000000e+00 : f32
    %14 = vector.broadcast %cst_10 : f32 to vector<16x128xf32>
    %15 = arith.maximumf %13, %14 : vector<16x128xf32>
    %16 = arith.truncf %15 : vector<16x128xf32> to vector<16x128xbf16>
    %c0_11 = arith.constant 0 : index
    %c0_12 = arith.constant 0 : index
    %17 = vector.load %arg4[%c0_11, %c0_12] : memref<128x128xbf16, #tpu.memory_space<vmem>>, vector<128x128xbf16>
    %cst_13 = arith.constant dense<0.000000e+00> : vector<16x128xf32>
    %18 = tpu.matmul %16, %17, %cst_13 {dimension_numbers = #tpu.dot_dimension_numbers<[1], [0], [0], [1], [0, 0, 1, 1], [], []>} : vector<16x128xbf16>, vector<128x128xbf16>, vector<16x128xf32> -> vector<16x128xf32>
    %c2 = arith.constant 2 : index
    %c0_14 = arith.constant 0 : index
    %19 = vector.load %arg5[%c2, %c0_14] : memref<3x128xf32, #tpu.memory_space<vmem>>, vector<1x128xf32>
    %20 = vector.broadcast %19 : vector<1x128xf32> to vector<16x128xf32>
    %21 = arith.addf %18, %20 : vector<16x128xf32>
    %22 = arith.truncf %21 : vector<16x128xf32> to vector<16x128xbf16>
    %c0_15 = arith.constant 0 : index
    %c0_16 = arith.constant 0 : index
    %23 = vector.load %arg6[%c0_15, %c0_16] : memref<16x128xbf16, #tpu.memory_space<vmem>>, vector<16x128xbf16>
    tpu.vector_store %arg6[%c0_15, %c0_16], %22 {strides = array<i32>} : memref<16x128xbf16, #tpu.memory_space<vmem>>, vector<16x128xbf16>,
    return
  }
  func.func @transform_0(%arg0: i32) -> (i32, i32) {
    %c0_i32 = arith.constant 0 : i32
    %c0_i32_0 = arith.constant 0 : i32
    return %arg0, %c0_i32 : i32, i32
  }
  func.func @transform_1(%arg0: i32) -> (i32, i32) {
    %c0_i32 = arith.constant 0 : i32
    %c0_i32_0 = arith.constant 0 : i32
    %c0_i32_1 = arith.constant 0 : i32
    return %c0_i32, %c0_i32_0 : i32, i32
  }
  func.func @transform_2(%arg0: i32) -> (i32, i32) {
    %c0_i32 = arith.constant 0 : i32
    %c0_i32_0 = arith.constant 0 : i32
    %c0_i32_1 = arith.constant 0 : i32
    return %c0_i32, %c0_i32_0 : i32, i32
  }
  func.func @transform_3(%arg0: i32) -> (i32, i32) {
    %c0_i32 = arith.constant 0 : i32
    %c0_i32_0 = arith.constant 0 : i32
    %c0_i32_1 = arith.constant 0 : i32
    return %c0_i32, %c0_i32_0 : i32, i32
  }
  func.func @transform_4(%arg0: i32) -> (i32, i32) {
    %c0_i32 = arith.constant 0 : i32
    %c0_i32_0 = arith.constant 0 : i32
    %c0_i32_1 = arith.constant 0 : i32
    return %c0_i32, %c0_i32_0 : i32, i32
  }
  func.func @transform_5(%arg0: i32) -> (i32, i32) {
    %c0_i32 = arith.constant 0 : i32
    %c0_i32_0 = arith.constant 0 : i32
    return %arg0, %c0_i32 : i32, i32
  }
}

</mosaic_0001>

<bundles_post_ra>
// kernel: tpu_custom_call.1
= control target key start
LH: loop header
LB: loop body
LE: loop exit
PB: predicated region body
PF: predicated region fallthrough
CT: control target
= control target key end

     0   :  { %10 = vsyncpa [#allocation3], 0  ;;  %s1451_s0 = inlined_call_operand.hbm [shape: bf16[16,784], index: 0, kind: input, shape index: {}]   ;;  %s1452_s1 = inlined_call_operand.hbm [shape: bf16[784,128], index: 1, kind: input, shape index: {}]   ;;  %s1453_s2 = inlined_call_operand.hbm [shape: bf16[128,128], index: 2, kind: input, shape index: {}]   ;;  %s1454_s3 = inlined_call_operand.hbm [shape: bf16[128,128], index: 3, kind: input, shape index: {}]   ;;  %s1455_s4 = inlined_call_operand.vmem [shape: f32[3,128], index: 4, kind: input, shape index: {}]   ;;  %s1456_s5 = inlined_call_operand.hbm [shape: bf16[16,128], index: 5, kind: output, shape index: {}]  }
   0x1   :  { %11 = vsyncpa [#allocation6], 0 }
   0x2   :  { %12 = vsyncpa [#allocation9], 0 }
   0x3   :  { %13 = vsyncpa [#allocation4], 0  ;;  %s1351_s18 = smov [#allocation5]  }
   0x4   :  { %s31_s19 = sshll.u32 %s1351_s18, 4  ;;  %s32_s19 = int_to_ptr.vmem [resolvable:$true] %s31_s19 }
   0x5   :  { %s1251_s20 = scalar_lea.vmem %s32_s19, 6272  ;;  %p1256_p1 = scmp.lt.s32.totalorder %s32_s19, %s32_s19 }
   0x6   :  { %p1252_p0 = scmp.ne.s32.totalorder %s32_s19, %s1251_s20  ;;  %p1257_p2 = scmp.lt.s32.totalorder %s1251_s20, %s1251_s20 }
   0x8   :  { %p1258_p3 = por %p1257_p2, %p1256_p1 }
   0xa   :  { %p1259_p4 = pnand %p1258_p3, %p1252_p0 }
   0xc   :  { %1262 = shalt.err (!%p1259_p4)
}
   0xd   :  { %s1352_s21 = smov 64   ;;  %s1353_s22 = smov 4  }
   0xe   :  { %37 = dma.hbm_to_vmem [thread:$0]  %s1452_s1, 6272, %s32_s19, [#allocation6], %s1352_s21, %s1352_s21, %s1353_s22  }
   0xf   :  { %s1354_s25 = smov [#allocation2]  }
  0x10   :  { %s19_s26 = sshll.u32 %s1354_s25, 4  ;;  %s20_s26 = int_to_ptr.vmem [resolvable:$true] %s19_s26 }
  0x11   :  { %s1271_s27 = scalar_lea.vmem %s20_s26, 896  ;;  %p1276_p6 = scmp.lt.s32.totalorder %s20_s26, %s20_s26 }
  0x12   :  { %p1272_p5 = scmp.ne.s32.totalorder %s20_s26, %s1271_s27  ;;  %p1277_p7 = scmp.lt.s32.totalorder %s1271_s27, %s1271_s27 }
  0x14   :  { %p1278_p8 = por %p1277_p7, %p1276_p6 }
  0x16   :  { %p1279_p9 = pnand %p1278_p8, %p1272_p5 }
  0x18   :  { %1282 = shalt.err (!%p1279_p9)
}
  0x19   :  { %s1355_s28 = smov 448   ;;  %s1356_s29 = smov 28  }
  0x1a   :  { %25 = dma.hbm_to_vmem [thread:$0]  %s1451_s0, 896, %s20_s26, [#allocation3], %s1355_s28, %s1355_s28, %s1356_s29  }
  0x1b   :  { %s1357_s7 = smov [#allocation7]   ;;  %s1358_s9 = smov [#allocation8]  }
  0x1c   :  { %s43_s8 = sshll.u32 %s1357_s7, 4  ;;  %s55_s1 = sshll.u32 %s1358_s9, 4  ;;  %s44_s8 = int_to_ptr.vmem [resolvable:$true] %s43_s8  ;;  %s56_s1 = int_to_ptr.vmem [resolvable:$true] %s55_s1 }
  0x1d   :  { %s1291_s10 = scalar_lea.vmem %s44_s8, 1024  ;;  %p1296_p11 = scmp.lt.s32.totalorder %s44_s8, %s44_s8 }
  0x1e   :  { %p1292_p10 = scmp.ne.s32.totalorder %s44_s8, %s1291_s10  ;;  %p1297_p12 = scmp.lt.s32.totalorder %s1291_s10, %s1291_s10 }
  0x20   :  { %p1298_p13 = por %p1297_p12, %p1296_p11 }
  0x22   :  { %p1299_p0 = pnand %p1298_p13, %p1292_p10 }
  0x24   :  { %1302 = shalt.err (!%p1299_p0)
}
  0x25   :  { %49 = dma.hbm_to_vmem [thread:$0]  %s1453_s2, 1024, %s44_s8, [#allocation6], %s1352_s21, %s1352_s21, %s1353_s22  }
  0x26   :  { %s1311_s0 = scalar_lea.vmem %s56_s1, 1024  ;;  %p1316_p2 = scmp.lt.s32.totalorder %s56_s1, %s56_s1 }
  0x27   :  { %p1312_p1 = scmp.ne.s32.totalorder %s56_s1, %s1311_s0  ;;  %p1317_p3 = scmp.lt.s32.totalorder %s1311_s0, %s1311_s0 }
  0x29   :  { %p1318_p4 = por %p1317_p3, %p1316_p2 }
  0x2b   :  { %p1319_p5 = pnand %p1318_p4, %p1312_p1 }
  0x2d   :  { %1322 = shalt.err (!%p1319_p5)
}
  0x2e   :  { %61 = dma.hbm_to_vmem [thread:$0]  %s1454_s3, 1024, %s56_s1, [#allocation9], %s1352_s21, %s1352_s21, %s1353_s22  }
  0x2f   :  { %1343 = dma.done.wait [#allocation3], 896  }
  0x30   :  { %1344 = vsyncadd [#allocation3], 4294966400 }
  0x31   :  { %1345 = dma.done.wait [#allocation6], 7296  }
  0x32   :  { %1346 = vsyncadd [#allocation6], 4294960000 }
  0x33   :  { %1347 = dma.done.wait [#allocation9], 1024  }
  0x34   :  { %1348 = vsyncadd [#allocation9], 4294966272  ;;  %v1168_v0 = vld [vmem:[#allocation5 + $0x78] sm:$0xff]   ;;  %v1172_v4 = vld [vmem:[#allocation5 + $0x70] sm:$0xff]   ;;  %v1359_v38 = vmov 0.0   ;;  %vm1360_vm0 = vmmov 0  }
  0x35   :  { %v1169_v1 = vld [vmem:[#allocation5 + $0x38] sm:$0xff]   ;;  %1025 = vmatprep.subr.bf16.mxu0 %v1168_v0  ;;  %v1173_v5 = vld [vmem:[#allocation5 + $0x30] sm:$0xff]   ;;  %v1176_v8 = vld [vmem:[#allocation5 + $0x68] sm:$0xff]   ;;  %vm517_vm1 = vcmask 130048   ;;  %s1361_s19 = smov [#allocation10]  }
  0x36   :  { %v1170_v2 = vld [vmem:[#allocation5 + $0xf8] sm:$0xff]   ;;  %1026 = vmatpush3.bf16.msra.mxu0 %v1169_v1  ;;  %v1174_v6 = vld [vmem:[#allocation5 + $0xf0] sm:$0xff]   ;;  %v1177_v9 = vld [vmem:[#allocation5 + $0x28] sm:$0xff]   ;;  %s926_s20 = sshll.u32 %s1361_s19, 4  ;;  %s927_s20 = int_to_ptr.vmem [resolvable:$true] %s926_s20 }
  0x37   :  { %v1171_v3 = vld [vmem:[#allocation5 + $0xb8] sm:$0xff]   ;;  %1047 = vmatprep.subr.bf16.mxu1 %v1170_v2  ;;  %1027 = vmatprep.subr.bf16.mxu0 %v1172_v4  ;;  %v1175_v7 = vld [vmem:[#allocation5 + $0xb0] sm:$0xff]   ;;  %v1178_v10 = vld [vmem:[#allocation5 + $0xe8] sm:$0xff]   ;;  %s1323_s23 = scalar_lea.vmem %s927_s20, 128  ;;  %p1328_p7 = scmp.lt.s32.totalorder %s927_s20, %s927_s20 }
  0x38   :  { %1048 = vmatpush3.bf16.msra.mxu1 %v1171_v3  ;;  %v1179_v11 = vld [vmem:[#allocation5 + $0xa8] sm:$0xff]   ;;  %v1180_v12 = vld [vmem:[#allocation5 + $0x60] sm:$0xff]   ;;  %v1184_v16 = vld [vmem:[#allocation5 + $0x58] sm:$0xff]   ;;  %p1324_p6 = scmp.ne.s32.totalorder %s927_s20, %s1323_s23  ;;  %p1329_p8 = scmp.lt.s32.totalorder %s1323_s23, %s1323_s23 }
  0x39   :  { %1049 = vmatprep.subr.bf16.mxu1 %v1174_v6  ;;  %v1181_v13 = vld [vmem:[#allocation5 + $0x20] sm:$0xff]   ;;  %v1185_v17 = vld [vmem:[#allocation5 + $0x18] sm:$0xff]   ;;  %v1188_v20 = vld [vmem:[#allocation5 + $0x50] sm:$0xff]  }
  0x3a   :  { %1028 = vmatpush3.bf16.msra.mxu0 %v1173_v5  ;;  %v1182_v14 = vld [vmem:[#allocation5 + $0xe0] sm:$0xff]   ;;  %v1186_v18 = vld [vmem:[#allocation5 + $0xd8] sm:$0xff]   ;;  %v1189_v21 = vld [vmem:[#allocation5 + $0x10] sm:$0xff]   ;;  %p1330_p9 = por %p1329_p8, %p1328_p7 }
  0x3b   :  { %1029 = vmatprep.subr.bf16.mxu0 %v1176_v8  ;;  %v1183_v15 = vld [vmem:[#allocation5 + $0xa0] sm:$0xff]   ;;  %v1187_v19 = vld [vmem:[#allocation5 + $0x98] sm:$0xff]   ;;  %v1190_v22 = vld [vmem:[#allocation5 + $0xd0] sm:$0xff]  }
  0x3c   :  { %1050 = vmatpush3.bf16.msra.mxu1 %v1175_v7  ;;  %v1191_v23 = vld [vmem:[#allocation5 + $0x90] sm:$0xff]   ;;  %v1192_v24 = vld [vmem:[#allocation5 + $0x48] sm:$0xff]   ;;  %v1196_v28 = vld [vmem:[#allocation5 + $0x40] sm:$0xff]   ;;  %p1331_p10 = pnand %p1330_p9, %p1324_p6 }
  0x3d   :  { %1051 = vmatprep.subr.bf16.mxu1 %v1178_v10  ;;  %v1193_v25 = vld [vmem:[#allocation5 + $0x8] sm:$0xff]   ;;  %v1197_v29 = vld [vmem:[#allocation5] sm:$0xff]   ;;  %v1203_v34 = vld [vmem:[#allocation5 + $0x178] sm:$0xff]  }
  0x3e   :  { %1030 = vmatpush3.bf16.msra.mxu0 %v1177_v9  ;;  %v1194_v26 = vld [vmem:[#allocation5 + $0xc8] sm:$0xff]   ;;  %v1198_v30 = vld [vmem:[#allocation5 + $0xc0] sm:$0xff]   ;;  %v1206_v36 = vld [vmem:[#allocation2 + $0xc] ss:$28 sps:$4 sm:$0xff]  }
  0x3f   :  { %1031 = vmatprep.subr.bf16.mxu0 %v1180_v12  ;;  %v1195_v27 = vld [vmem:[#allocation5 + $0x88] sm:$0xff]   ;;  %v1202_v33 = vld [vmem:[#allocation5 + $0x80] sm:$0xff]   ;;  %v1207_v37 = vld [vmem:[#allocation5 + $0x138] sm:$0xff]   ;;  %594 = vmatprep.mubr.bf16.mxu1 %v1206_v36 }
  0x40   :  { %1052 = vmatpush3.bf16.msra.mxu1 %v1179_v11  ;;  %v1199_v31 = vld [vmem:[#allocation2] ss:$28 sps:$4 sm:$0xff]   ;;  %v1204_v35 = vld [vmem:[#allocation2 + $0x8] ss:$28 sps:$4 sm:$0xff]   ;;  %v1214_v45 = vld [vmem:[#allocation5 + $0x158] sm:$0xff]  }
  0x41   :  { %1053 = vmatprep.subr.bf16.mxu1 %v1182_v14  ;;  %v1201_v32 = vld [vmem:[#allocation2 + $0x4] ss:$28 sps:$4 sm:$0xff]   ;;  %v1208_v39 = vld [vmem:[#allocation5 + $0x170] sm:$0xff]   ;;  %v1212_v43 = vld [vmem:[#allocation5 + $0x160] sm:$0xff]  }
  0x42   :  { %1032 = vmatpush3.bf16.msra.mxu0 %v1181_v13  ;;  %553 = vmatprep.mubr.bf16.mxu0 %v1201_v32  ;;  %v1209_v40 = vld [vmem:[#allocation5 + $0x130] sm:$0xff]   ;;  %v1210_v41 = vld [vmem:[#allocation5 + $0x168] sm:$0xff]   ;;  %v1213_v44 = vld [vmem:[#allocation5 + $0x120] sm:$0xff]  }
  0x43   :  { %1033 = vmatprep.subr.bf16.mxu0 %v1184_v16  ;;  %v1211_v42 = vld [vmem:[#allocation5 + $0x128] sm:$0xff]   ;;  %v1215_v46 = vld [vmem:[#allocation5 + $0x118] sm:$0xff]   ;;  %v1216_v47 = vld [vmem:[#allocation5 + $0x150] sm:$0xff]  }
  0x44   :  { %1054 = vmatpush3.bf16.msra.mxu1 %v1183_v15  ;;  %v1222_v48 = vld [vmem:[#allocation5 + $0x180] sm:$0xff]   ;;  %v1217_v49 = vld [vmem:[#allocation5 + $0x110] sm:$0xff]   ;;  %v1225_v50 = vld [vmem:[#allocation2 + $0x14] ss:$28 sps:$4 sm:$0xff]  }
  0x45   :  { %1055 = vmatprep.subr.bf16.mxu1 %v1186_v18  ;;  %v1218_v51 = vld [vmem:[#allocation5 + $0x148] sm:$0xff]   ;;  %v1226_v52 = vld [vmem:[#allocation2 + $0x18] ss:$28 sps:$4 sm:$0xff]   ;;  %v1223_v56 = vld [vmem:[#allocation2 + $0x10] ss:$28 sps:$4 sm:$0xff]  }
  0x46   :  { %1034 = vmatpush3.bf16.msra.mxu0 %v1185_v17  ;;  %v1219_v53 = vld [vmem:[#allocation5 + $0x108] sm:$0xff]   ;;  %v1220_v54 = vld [vmem:[#allocation5 + $0x140] sm:$0xff]   ;;  %v1228_v58 = vld [vmem:[#allocation7 + $0x30] sm:$0xff]  }
  0x47   :  { %1035 = vmatprep.subr.bf16.mxu0 %v1188_v20  ;;  %v1221_v55 = vld [vmem:[#allocation5 + $0x100] sm:$0xff]   ;;  %v1229_v59 = vld [vmem:[#allocation7 + $0x28] sm:$0xff]   ;;  %v1230_v60 = vld [vmem:[#allocation7 + $0x20] sm:$0xff]  }
  0x48   :  { %1056 = vmatpush3.bf16.msra.mxu1 %v1187_v19  ;;  %v1227_v57 = vld [vmem:[#allocation7 + $0x38] sm:$0xff]   ;;  %v1232_v62 = vld [vmem:[#allocation7 + $0x10] sm:$0xff]   ;;  %v1233_v63 = vld [vmem:[#allocation7 + $0x8] sm:$0xff]  }
  0x49   :  { %1057 = vmatprep.subr.bf16.mxu1 %v1190_v22  ;;  %v1231_v61 = vld [vmem:[#allocation7 + $0x18] sm:$0xff]   ;;  %v1234_v0 = vld [vmem:[#allocation7] sm:$0xff]   ;;  %v1236_v2 = vld [vmem:[#allocation8 + $0x30] sm:$0xff]  }
  0x4a   :  { %1036 = vmatpush3.bf16.msra.mxu0 %v1189_v21  ;;  %v1235_v1 = vld [vmem:[#allocation8 + $0x38] sm:$0xff]   ;;  %v1237_v3 = vld [vmem:[#allocation8 + $0x28] sm:$0xff]   ;;  %v1238_v4 = vld [vmem:[#allocation8 + $0x20] sm:$0xff]  }
  0x4b   :  { %1037 = vmatprep.subr.bf16.mxu0 %v1192_v24  ;;  %v1239_v5 = vld [vmem:[#allocation8 + $0x18] sm:$0xff]   ;;  %v940_v18 = vld [vmem:[%s1455_s4] ss:$0 sm:$0xff] }
  0x4c   :  { %1058 = vmatpush3.bf16.msra.mxu1 %v1191_v23 }
  0x4d   :  { %1059 = vmatprep.subr.bf16.mxu1 %v1194_v26 }
  0x4e   :  { %1038 = vmatpush3.bf16.msra.mxu0 %v1193_v25 }
  0x4f   :  { %1039 = vmatprep.subr.bf16.mxu0 %v1196_v28 }
  0x50   :  { %1060 = vmatpush3.bf16.msra.mxu1 %v1195_v27 }
  0x51   :  { %1061 = vmatprep.subr.bf16.mxu1 %v1198_v30 }
  0x52   :  { %1040 = vmatpush3.bf16.msra.mxu0 %v1197_v29 }
  0x53   :  { %1069 = vmatprep.subr.bf16.mxu0 %v1203_v34 }
  0x54   :  { %1062 = vmatpush3.bf16.msra.mxu1 %v1202_v33 }
  0x55   :  { %554 = vmatmul.mubr.bf16.vlgmr.msra.gmra.mxu0 %v1199_v31  ;;  %1111 = vmatprep.subr.bf16.mxu1 %v1359_v38 }
  0x56   :  { %1070 = vmatpush3.bf16.msra.mxu0 %v1207_v37  ;;  %635 = vmatprep.mubr.bf16.mxu0 %v1225_v50 }
  0x57   :  { %595 = vmatmul.mubr.bf16.vlgmr.msra.gmra.mxu1 %v1204_v35  ;;  %1071 = vmatprep.subr.bf16.mxu0 %v1208_v39 }
  0x58   :  { %1113 = vmatprep.mubr.msk.bf16.mxu1 %vm1360_vm0, %v1359_v38  ;;  %1112 = vmatpush3.bf16.msra.mxu1 %v1222_v48 }
  0x59   :  { %1117 = vmatprep.subr.bf16.mxu1 %v1359_v38 }
  0x5a   :  { %1072 = vmatpush3.bf16.msra.mxu0 %v1209_v40 }
  0x5b   :  { %1073 = vmatprep.subr.bf16.mxu0 %v1210_v41  ;;  %v1240_v41 = vld [vmem:[#allocation8 + $0x10] sm:$0xff]  }
  0x5e   :  { %1074 = vmatpush3.bf16.msra.mxu0 %v1211_v42  ;;  %v1241_v42 = vld [vmem:[#allocation8 + $0x8] sm:$0xff]  }
  0x5f   :  { %1075 = vmatprep.subr.bf16.mxu0 %v1212_v43  ;;  %1114 = vmatmul.mubr.msk.bf16.vlgmr.msra.gmra.mxu1 %vm517_vm1, %v1226_v52  ;;  %v1242_v43 = vld [vmem:[#allocation8] sm:$0xff]  }
  0x60   :  { %1133 = vmatprep.mubr.msk.bf16.mxu1 %vm1360_vm0, %v1359_v38  ;;  %1118 = vmatpush3.bf16.msra.mxu1 %v1227_v57 }
  0x61   :  { %1119 = vmatprep.subr.bf16.mxu1 %v1359_v38 }
  0x62   :  { %1076 = vmatpush3.bf16.msra.mxu0 %v1213_v44  ;;  %v998_v44 = vld [vmem:[%s1455_s4 + $0x1] ss:$0 sm:$0xff] }
  0x63   :  { %1077 = vmatprep.subr.bf16.mxu0 %v1214_v45 }
  0x64   :  { %1120 = vmatpush3.bf16.msra.mxu1 %v1228_v58 }
  0x65   :  { %1121 = vmatprep.subr.bf16.mxu1 %v1359_v38 }
  0x66   :  { %1078 = vmatpush3.bf16.msra.mxu0 %v1215_v46 }
  0x67   :  { %1079 = vmatprep.subr.bf16.mxu0 %v1216_v47 }
  0x68   :  { %1122 = vmatpush3.bf16.msra.mxu1 %v1229_v59 }
  0x69   :  { %1123 = vmatprep.subr.bf16.mxu1 %v1359_v38 }
  0x6a   :  { %1080 = vmatpush3.bf16.msra.mxu0 %v1217_v49 }
  0x6b   :  { %1081 = vmatprep.subr.bf16.mxu0 %v1218_v51 }
  0x6c   :  { %1124 = vmatpush3.bf16.msra.mxu1 %v1230_v60 }
  0x6d   :  { %1125 = vmatprep.subr.bf16.mxu1 %v1359_v38 }
  0x6e   :  { %1082 = vmatpush3.bf16.msra.mxu0 %v1219_v53 }
  0x6f   :  { %1083 = vmatprep.subr.bf16.mxu0 %v1220_v54 }
  0x70   :  { %1126 = vmatpush3.bf16.msra.mxu1 %v1231_v61 }
  0x71   :  { %1127 = vmatprep.subr.bf16.mxu1 %v1359_v38 }
  0x72   :  { %1084 = vmatpush3.bf16.msra.mxu0 %v1221_v55 }
  0x73   :  { %1137 = vmatprep.subr.bf16.mxu0 %v1359_v38 }
  0x74   :  { %1128 = vmatpush3.bf16.msra.mxu1 %v1232_v62 }
  0x75   :  { %636 = vmatmul.mubr.bf16.vlgmr.msra.gmra.mxu0 %v1223_v56  ;;  %1129 = vmatprep.subr.bf16.mxu1 %v1359_v38 }
  0x76   :  { %1153 = vmatprep.mubr.msk.bf16.mxu0 %vm1360_vm0, %v1359_v38  ;;  %1138 = vmatpush3.bf16.msra.mxu0 %v1235_v1 }
  0x77   :  { %1139 = vmatprep.subr.bf16.mxu0 %v1359_v38 }
  0x78   :  { %1130 = vmatpush3.bf16.msra.mxu1 %v1233_v63 }
  0x79   :  { %1131 = vmatprep.subr.bf16.mxu1 %v1359_v38 }
  0x7a   :  { %1140 = vmatpush3.bf16.msra.mxu0 %v1236_v2 }
  0x7b   :  { %1141 = vmatprep.subr.bf16.mxu0 %v1359_v38 }
  0x7c   :  { %1132 = vmatpush3.bf16.msra.mxu1 %v1234_v0 }
  0x7e   :  { %1142 = vmatpush3.bf16.msra.mxu0 %v1237_v3 }
  0x7f   :  { %1143 = vmatprep.subr.bf16.mxu0 %v1359_v38 }
  0x82   :  { %1144 = vmatpush3.bf16.msra.mxu0 %v1238_v4 }
  0x83   :  { %1145 = vmatprep.subr.bf16.mxu0 %v1359_v38 }
  0x86   :  { %1146 = vmatpush3.bf16.msra.mxu0 %v1239_v5 }
  0x87   :  { %1147 = vmatprep.subr.bf16.mxu0 %v1359_v38 }
  0x8a   :  { %1148 = vmatpush3.bf16.msra.mxu0 %v1240_v41 }
  0x8b   :  { %1149 = vmatprep.subr.bf16.mxu0 %v1359_v38 }
  0x8e   :  { %1150 = vmatpush3.bf16.msra.mxu0 %v1241_v42 }
  0x8f   :  { %1151 = vmatprep.subr.bf16.mxu0 %v1359_v38  ;;  %v1007_v38 = vld [vmem:[%s1455_s4 + $0x2] ss:$0 sm:$0xff] }
  0x92   :  { %1152 = vmatpush3.bf16.msra.mxu0 %v1242_v43 }
 0x115   :  { %v1041_v9 = vpop.f32.mrf.mxu0 }
 0x117   :  { %v1063_v6 = vpop.f32.mrf.mxu1  ;;  %v1042_v12 = vpop.f32.mrf.mxu0 }
 0x118   :  { %v1043_v17 = vadd.f32 %v1042_v12, %v1041_v9 }
 0x119   :  { %v1064_v7 = vpop.f32.mrf.mxu1  ;;  %v1044_v15 = vpop.f32.mrf.mxu0 }
 0x11a   :  { %v556_v20 = vadd.f32 %v1043_v17, %v940_v18  ;;  %v1065_v21 = vadd.f32 %v1064_v7, %v1063_v6 }
 0x11b   :  { %v1066_v8 = vpop.f32.mrf.mxu1  ;;  %v1045_v19 = vpop.f32.mrf.mxu0 }
 0x11c   :  { %v1046_v22 = vadd.f32 %v1045_v19, %v1044_v15  ;;  %v597_v25 = vadd.f32 %v1065_v21, %v556_v20 }
 0x11d   :  { %v1067_v10 = vpop.f32.mrf.mxu1 }
 0x11e   :  { %v559_v26 = vadd.f32 %v1046_v22, %v940_v18  ;;  %v1068_v27 = vadd.f32 %v1067_v10, %v1066_v8 }
 0x11f   :  { %v678_v11 = vpop.f32.mrf.mxu1 }
 0x120   :  { %v600_v32 = vadd.f32 %v1068_v27, %v559_v26 }
 0x121   :  { %v1115_v13 = vpop.f32.mrf.mxu1 }
 0x123   :  { %v681_v14 = vpop.f32.mrf.mxu1 }
 0x125   :  { %v1116_v16 = vpop.f32.mrf.mxu1 }
 0x135   :  { %v1085_v23 = vpop.f32.mrf.mxu0 }
 0x137   :  { %v1086_v24 = vpop.f32.mrf.mxu0 }
 0x138   :  { %v1087_v28 = vadd.f32 %v1086_v24, %v1085_v23 }
 0x139   :  { %v1088_v29 = vpop.f32.mrf.mxu0 }
 0x13a   :  { %v638_v30 = vadd.f32 %v1087_v28, %v597_v25 }
 0x13b   :  { %v1089_v31 = vpop.f32.mrf.mxu0 }
 0x13c   :  { %v1090_v33 = vadd.f32 %v1089_v31, %v1088_v29  ;;  %v679_v34 = vadd.f32 %v678_v11, %v638_v30 }
 0x13e   :  { %v641_v35 = vadd.f32 %v1090_v33, %v600_v32  ;;  %v685_v37 = vmax.f32 %v679_v34, 0.0 }
 0x140   :  { %v682_v36 = vadd.f32 %v681_v14, %v641_v35 }
 0x142   :  { %v686_v39 = vmax.f32 %v682_v36, 0.0 }
 0x144   :  { %v687_v40 = vpack.c.bf16 %v686_v39, %v685_v37 }
 0x146   :  { %1134 = vmatmul.mubr.bf16.vlgmr.msra.gmra.mxu1 %v687_v40 }
 0x206   :  { %v791_v45 = vpop.f32.mrf.mxu1 }
 0x207   :  { %v792_v47 = vadd.f32 %v998_v44, %v791_v45 }
 0x208   :  { %v1135_v46 = vpop.f32.mrf.mxu1 }
 0x209   :  { %v798_v51 = vmax.f32 %v792_v47, 0.0 }
 0x20a   :  { %v794_v48 = vpop.f32.mrf.mxu1 }
 0x20b   :  { %v795_v49 = vadd.f32 %v998_v44, %v794_v48 }
 0x20c   :  { %v1136_v50 = vpop.f32.mrf.mxu1 }
 0x20d   :  { %v799_v52 = vmax.f32 %v795_v49, 0.0 }
 0x20f   :  { %v800_v53 = vpack.c.bf16 %v799_v52, %v798_v51 }
 0x211   :  { %1154 = vmatmul.mubr.bf16.vlgmr.msra.gmra.mxu0 %v800_v53 }
 0x2d1   :  { %v904_v54 = vpop.f32.mrf.mxu0 }
 0x2d2   :  { %v905_v57 = vadd.f32 %v1007_v38, %v904_v54 }
 0x2d3   :  { %v1155_v55 = vpop.f32.mrf.mxu0 }
 0x2d5   :  { %v907_v56 = vpop.f32.mrf.mxu0 }
 0x2d6   :  { %v908_v58 = vadd.f32 %v1007_v38, %v907_v56 }
 0x2d7   :  { %v1156_v59 = vpop.f32.mrf.mxu0 }
 0x2d8   :  { %v1023_v60 = vpack.c.bf16 %v908_v58, %v905_v57 }
 0x2da   :  { %1024 = vst [vmem:[#allocation10] sm:$0xff] %v1023_v60  }
 0x2db   :  { %1334 = shalt.err (!%p1331_p10)
}
 0x2dc   :  { %932 = dma.vmem_to_hbm [thread:$0]  %s927_s20, 128, %s1456_s5, [#allocation4], %s1352_s21, %s1352_s21, %s1353_s22  }
 0x2dd   :  { %1349 = dma.done.wait [#allocation4], 128  }
 0x2de   :  { %1350 = vsyncadd [#allocation4], 4294967168 }
 0x2df   :  { %936 = vsyncpa [#allocation3], 1 }
 0x2e0   :  { %937 = vsyncpa [#allocation6], 1 }
 0x2e1   :  { %938 = vsyncpa [#allocation9], 1 }
 0x2e2   :  { %939 = vsyncpa [#allocation4], 1 }

</bundles_post_ra>
